<compile_context>
chip_gen: v5e
topology: v5e:2x2
jax: 0.10.0
libtpu: 0.0.40
codegen_flags: <defaults>
</compile_context>

<pallas_src>
import functools

import jax
import jax.numpy as jnp
from jax.experimental import pallas as pl
from jax.experimental.pallas import tpu as pltpu

D_IN, H1, H2, D_OUT = 784, 128, 64, 10


def _round_up(n, m):
    return (n + m - 1) // m * m


def mlp_kernel(x_ref, w1_ref, b1_ref, w2_ref, b2_ref, w3_ref, b3_ref, o_ref):
    # fc1 + ReLU  (dropout = identity in eval mode).  bf16 operands, f32 acc.
    x = x_ref[...].astype(jnp.bfloat16)
    h1 = jnp.dot(x, w1_ref[...], preferred_element_type=jnp.float32)
    h1 = jnp.maximum(h1 + b1_ref[...], 0.0)

    # fc2 + ReLU
    h2 = jnp.dot(h1.astype(jnp.bfloat16), w2_ref[...],
                 preferred_element_type=jnp.float32)
    h2 = jnp.maximum(h2 + b2_ref[...], 0.0)

    # fc3 (true class dim = 10; Mosaic masks the partial lane tile)
    logits = jnp.dot(h2.astype(jnp.bfloat16), w3_ref[...],
                     preferred_element_type=jnp.float32)
    logits = logits + b3_ref[...]

    # log_softmax along the class dim.
    m = jnp.max(logits, axis=-1, keepdims=True)
    shifted = logits - m
    lse = jnp.log(jnp.sum(jnp.exp(shifted), axis=-1, keepdims=True))
    o_ref[...] = (shifted - lse).astype(o_ref.dtype)


def prepare_params(params):
    """One-time weight prep (hoisted out of the per-call path):
    bf16 matmul weights, f32 row-vector biases."""
    w1, b1, w2, b2, w3, b3 = params
    return (
        w1.astype(jnp.bfloat16),
        b1.reshape(1, H1).astype(jnp.float32),
        w2.astype(jnp.bfloat16),
        b2.reshape(1, H2).astype(jnp.float32),
        w3.astype(jnp.bfloat16),
        b3.reshape(1, D_OUT).astype(jnp.float32),
    )


def _choose_tiling(B, block_b):
    # >= 2 grid steps once B is big enough to amortize the ~0.35us/step
    # overhead, so ("parallel",) actually uses both v7x TensorCores; tile is
    # only padded to a multiple of 8 rows, never rounded up to a full block_b.
    if B <= 64:
        num_tiles = 1
    else:
        num_tiles = max(pl.cdiv(B, block_b), 2)
    bb = _round_up(pl.cdiv(B, num_tiles), 8)
    return num_tiles, bb


@functools.partial(jax.jit, static_argnames=("block_b",))
def my_neural_net(x, prepared_params, *, block_b=1024):
    w1, b1, w2, b2, w3, b3 = prepared_params
    B = x.shape[0]

    num_tiles, bb = _choose_tiling(B, block_b)
    B_pad = num_tiles * bb
    grid = (num_tiles,)

    # Batch rows padded to the tile multiple only when needed (pad rows are
    # sliced off at the end; each row's computation is independent).
    xp = x if B_pad == B else jnp.pad(x, ((0, B_pad - B), (0, 0)))

    def batch_map(i):
        return (i, 0)

    def weight_map(i):
        return (0, 0)

    x_bytes = B_pad * D_IN * xp.dtype.itemsize
    weight_bytes = (D_IN * H1 + H1 * H2 + H2 * D_OUT) * 2 + (H1 + H2 + D_OUT) * 4
    cost = pl.CostEstimate(
        flops=2 * B_pad * (D_IN * H1 + H1 * H2 + H2 * D_OUT),
        transcendentals=B_pad * (D_OUT + 1),                  # exp + log
        bytes_accessed=x_bytes + weight_bytes + B_pad * D_OUT * 4,
    )

    out = pl.pallas_call(
        mlp_kernel,
        out_shape=jax.ShapeDtypeStruct((B_pad, D_OUT), jnp.float32),
        grid_spec=pltpu.PrefetchScalarGridSpec(
            num_scalar_prefetch=0,
            grid=grid,
            in_specs=[
                pl.BlockSpec((bb, D_IN), batch_map),      # x tile (orig dtype)
                pl.BlockSpec((D_IN, H1), weight_map),     # w1 (bf16)
                pl.BlockSpec((1, H1), weight_map),        # b1 (f32)
                pl.BlockSpec((H1, H2), weight_map),       # w2 (bf16)
                pl.BlockSpec((1, H2), weight_map),        # b2 (f32)
                pl.BlockSpec((H2, D_OUT), weight_map),    # w3 (bf16)
                pl.BlockSpec((1, D_OUT), weight_map),     # b3 (f32)
            ],
            out_specs=pl.BlockSpec((bb, D_OUT), batch_map),
        ),
        compiler_params=pltpu.CompilerParams(
            dimension_semantics=("parallel",),
            vmem_limit_bytes=32 * 1024 * 1024,
        ),
        cost_estimate=cost,
    )(xp, w1, b1, w2, b2, w3, b3)

    return out if B_pad == B else out[:B]


def init_params(key):
    """Deterministic init mimicking nn.Linear's U(-1/sqrt(fan_in), 1/sqrt(fan_in))."""
    ks = jax.random.split(key, 6)

    def linear(kw, kb, fan_in, fan_out):
        bound = 1.0 / jnp.sqrt(fan_in)
        # stored as (in, out): transpose of PyTorch's (out, in)
        w = jax.random.uniform(kw, (fan_in, fan_out), jnp.float32, -bound, bound)
        b = jax.random.uniform(kb, (1, fan_out), jnp.float32, -bound, bound)
        return w, b

    w1, b1 = linear(ks[0], ks[1], D_IN, H1)
    w2, b2 = linear(ks[2], ks[3], H1, H2)
    w3, b3 = linear(ks[4], ks[5], H2, D_OUT)
    return (w1, b1, w2, b2, w3, b3)


def reference(x, params):
    """Plain-JAX reference using the same bf16 operands / f32 accumulation."""
    w1, b1, w2, b2, w3, b3 = params
    h1 = jnp.dot(x.astype(jnp.bfloat16), w1.astype(jnp.bfloat16),
                 preferred_element_type=jnp.float32) + b1
    h1 = jnp.maximum(h1, 0.0)
    h2 = jnp.dot(h1.astype(jnp.bfloat16), w2.astype(jnp.bfloat16),
                 preferred_element_type=jnp.float32) + b2
    h2 = jnp.maximum(h2, 0.0)
    logits = jnp.dot(h2.astype(jnp.bfloat16), w3.astype(jnp.bfloat16),
                     preferred_element_type=jnp.float32) + b3
    return jax.nn.log_softmax(logits, axis=1)


if __name__ == "__main__":
    key = jax.random.PRNGKey(0)
    k_x, k_p = jax.random.split(key)

    B = 20  # small batch; exercises batch padding (20 -> 24 rows)
    x = jax.random.normal(k_x, (B, D_IN), dtype=jnp.float32)
    params = init_params(k_p)
    prepared = prepare_params(params)   # one-time weight prep (bf16 cast)

    out = my_neural_net(x, prepared)
    out = jax.block_until_ready(out)

    ref = reference(x, params)
    assert out.shape == (B, D_OUT)
    assert jnp.all(jnp.isfinite(out)), "non-finite output"
    assert jnp.allclose(out, ref, atol=2e-2, rtol=2e-2), "mismatch vs JAX reference"

    print("KERNEL_OK")
</pallas_src>

<mosaic_0001>
module attributes {stable_mosaic.version = 11 : i64} {
  func.func @mlp_kernel(%arg0: i32, %arg1: memref<24x784xf32, #tpu.memory_space<vmem>>, %arg2: memref<784x128xbf16, #tpu.memory_space<vmem>>, %arg3: memref<1x128xf32, #tpu.memory_space<vmem>>, %arg4: memref<128x64xbf16, #tpu.memory_space<vmem>>, %arg5: memref<1x64xf32, #tpu.memory_space<vmem>>, %arg6: memref<64x10xbf16, #tpu.memory_space<vmem>>, %arg7: memref<1x10xf32, #tpu.memory_space<vmem>>, %arg8: memref<24x10xf32, #tpu.memory_space<vmem>>) attributes {dimension_semantics = [#tpu.dimension_semantics<parallel>], iteration_bounds = array<i64: 1>, scalar_prefetch = 0 : i64, scratch_operands = 0 : i64, tpu.core_type = #tpu.core_type<tc>, window_params = [{transform_indices = @transform_0, window_bounds = array<i64: 24, 784>}, {pipeline_mode = #tpu.pipeline_mode<synchronous>, transform_indices = @transform_1, window_bounds = array<i64: 784, 128>}, {pipeline_mode = #tpu.pipeline_mode<synchronous>, transform_indices = @transform_2, window_bounds = array<i64: 1, 128>}, {pipeline_mode = #tpu.pipeline_mode<synchronous>, transform_indices = @transform_3, window_bounds = array<i64: 128, 64>}, {pipeline_mode = #tpu.pipeline_mode<synchronous>, transform_indices = @transform_4, window_bounds = array<i64: 1, 64>}, {pipeline_mode = #tpu.pipeline_mode<synchronous>, transform_indices = @transform_5, window_bounds = array<i64: 64, 10>}, {pipeline_mode = #tpu.pipeline_mode<synchronous>, transform_indices = @transform_6, window_bounds = array<i64: 1, 10>}, {transform_indices = @transform_7, window_bounds = array<i64: 24, 10>}]} {
    %c0 = arith.constant 0 : index
    %c0_0 = arith.constant 0 : index
    %0 = vector.load %arg1[%c0, %c0_0] : memref<24x784xf32, #tpu.memory_space<vmem>>, vector<24x784xf32>
    %1 = arith.truncf %0 : vector<24x784xf32> to vector<24x784xbf16>
    %c0_1 = arith.constant 0 : index
    %c0_2 = arith.constant 0 : index
    %2 = vector.load %arg2[%c0_1, %c0_2] : memref<784x128xbf16, #tpu.memory_space<vmem>>, vector<784x128xbf16>
    %cst = arith.constant dense<0.000000e+00> : vector<24x128xf32>
    %3 = tpu.matmul %1, %2, %cst {dimension_numbers = #tpu.dot_dimension_numbers<[1], [0], [0], [1], [0, 0, 1, 1], [], []>} : vector<24x784xbf16>, vector<784x128xbf16>, vector<24x128xf32> -> vector<24x128xf32>
    %c0_3 = arith.constant 0 : index
    %c0_4 = arith.constant 0 : index
    %4 = vector.load %arg3[%c0_3, %c0_4] : memref<1x128xf32, #tpu.memory_space<vmem>>, vector<1x128xf32>
    %5 = vector.broadcast %4 : vector<1x128xf32> to vector<24x128xf32>
    %6 = arith.addf %3, %5 : vector<24x128xf32>
    %cst_5 = arith.constant 0.000000e+00 : f32
    %7 = vector.broadcast %cst_5 : f32 to vector<24x128xf32>
    %8 = arith.maximumf %6, %7 : vector<24x128xf32>
    %9 = arith.truncf %8 : vector<24x128xf32> to vector<24x128xbf16>
    %c0_6 = arith.constant 0 : index
    %c0_7 = arith.constant 0 : index
    %10 = vector.load %arg4[%c0_6, %c0_7] : memref<128x64xbf16, #tpu.memory_space<vmem>>, vector<128x64xbf16>
    %cst_8 = arith.constant dense<0.000000e+00> : vector<24x64xf32>
    %11 = tpu.matmul %9, %10, %cst_8 {dimension_numbers = #tpu.dot_dimension_numbers<[1], [0], [0], [1], [0, 0, 1, 1], [], []>} : vector<24x128xbf16>, vector<128x64xbf16>, vector<24x64xf32> -> vector<24x64xf32>
    %c0_9 = arith.constant 0 : index
    %c0_10 = arith.constant 0 : index
    %12 = vector.load %arg5[%c0_9, %c0_10] : memref<1x64xf32, #tpu.memory_space<vmem>>, vector<1x64xf32>
    %13 = vector.broadcast %12 : vector<1x64xf32> to vector<24x64xf32>
    %14 = arith.addf %11, %13 : vector<24x64xf32>
    %cst_11 = arith.constant 0.000000e+00 : f32
    %15 = vector.broadcast %cst_11 : f32 to vector<24x64xf32>
    %16 = arith.maximumf %14, %15 : vector<24x64xf32>
    %17 = arith.truncf %16 : vector<24x64xf32> to vector<24x64xbf16>
    %c0_12 = arith.constant 0 : index
    %c0_13 = arith.constant 0 : index
    %18 = vector.load %arg6[%c0_12, %c0_13] : memref<64x10xbf16, #tpu.memory_space<vmem>>, vector<64x10xbf16>
    %cst_14 = arith.constant dense<0.000000e+00> : vector<24x10xf32>
    %19 = tpu.matmul %17, %18, %cst_14 {dimension_numbers = #tpu.dot_dimension_numbers<[1], [0], [0], [1], [0, 0, 1, 1], [], []>} : vector<24x64xbf16>, vector<64x10xbf16>, vector<24x10xf32> -> vector<24x10xf32>
    %c0_15 = arith.constant 0 : index
    %c0_16 = arith.constant 0 : index
    %20 = vector.load %arg7[%c0_15, %c0_16] : memref<1x10xf32, #tpu.memory_space<vmem>>, vector<1x10xf32>
    %21 = vector.broadcast %20 : vector<1x10xf32> to vector<24x10xf32>
    %22 = arith.addf %19, %21 : vector<24x10xf32>
    %cst_17 = arith.constant dense<0xFF800000> : vector<24xf32>
    %23 = vector.multi_reduction <maximumf>, %22, %cst_17 [1] : vector<24x10xf32> to vector<24xf32>
    %24 = vector.shape_cast %23 : vector<24xf32> to vector<24x1xf32>
    %25 = vector.broadcast %24 : vector<24x1xf32> to vector<24x10xf32>
    %26 = arith.subf %22, %25 : vector<24x10xf32>
    %27 = math.exp %26 : vector<24x10xf32>
    %cst_18 = arith.constant dense<0.000000e+00> : vector<24xf32>
    %28 = vector.multi_reduction <add>, %27, %cst_18 [1] : vector<24x10xf32> to vector<24xf32>
    %29 = vector.shape_cast %28 : vector<24xf32> to vector<24x1xf32>
    %30 = math.log %29 : vector<24x1xf32>
    %31 = vector.broadcast %30 : vector<24x1xf32> to vector<24x10xf32>
    %32 = arith.subf %26, %31 : vector<24x10xf32>
    %c0_19 = arith.constant 0 : index
    %c0_20 = arith.constant 0 : index
    %33 = vector.load %arg8[%c0_19, %c0_20] : memref<24x10xf32, #tpu.memory_space<vmem>>, vector<24x10xf32>
    tpu.vector_store %arg8[%c0_19, %c0_20], %32 {strides = array<i32>} : memref<24x10xf32, #tpu.memory_space<vmem>>, vector<24x10xf32>,
    return
  }
  func.func @transform_0(%arg0: i32) -> (i32, i32) {
    %c0_i32 = arith.constant 0 : i32
    %c0_i32_0 = arith.constant 0 : i32
    return %arg0, %c0_i32 : i32, i32
  }
  func.func @transform_1(%arg0: i32) -> (i32, i32) {
    %c0_i32 = arith.constant 0 : i32
    %c0_i32_0 = arith.constant 0 : i32
    %c0_i32_1 = arith.constant 0 : i32
    return %c0_i32, %c0_i32_0 : i32, i32
  }
  func.func @transform_2(%arg0: i32) -> (i32, i32) {
    %c0_i32 = arith.constant 0 : i32
    %c0_i32_0 = arith.constant 0 : i32
    %c0_i32_1 = arith.constant 0 : i32
    return %c0_i32, %c0_i32_0 : i32, i32
  }
  func.func @transform_3(%arg0: i32) -> (i32, i32) {
    %c0_i32 = arith.constant 0 : i32
    %c0_i32_0 = arith.constant 0 : i32
    %c0_i32_1 = arith.constant 0 : i32
    return %c0_i32, %c0_i32_0 : i32, i32
  }
  func.func @transform_4(%arg0: i32) -> (i32, i32) {
    %c0_i32 = arith.constant 0 : i32
    %c0_i32_0 = arith.constant 0 : i32
    %c0_i32_1 = arith.constant 0 : i32
    return %c0_i32, %c0_i32_0 : i32, i32
  }
  func.func @transform_5(%arg0: i32) -> (i32, i32) {
    %c0_i32 = arith.constant 0 : i32
    %c0_i32_0 = arith.constant 0 : i32
    %c0_i32_1 = arith.constant 0 : i32
    return %c0_i32, %c0_i32_0 : i32, i32
  }
  func.func @transform_6(%arg0: i32) -> (i32, i32) {
    %c0_i32 = arith.constant 0 : i32
    %c0_i32_0 = arith.constant 0 : i32
    %c0_i32_1 = arith.constant 0 : i32
    return %c0_i32, %c0_i32_0 : i32, i32
  }
  func.func @transform_7(%arg0: i32) -> (i32, i32) {
    %c0_i32 = arith.constant 0 : i32
    %c0_i32_0 = arith.constant 0 : i32
    return %arg0, %c0_i32 : i32, i32
  }
}

</mosaic_0001>

<bundles_post_ra>
// kernel: my_neural_net.1
= control target key start
LH: loop header
LB: loop body
LE: loop exit
PB: predicated region body
PF: predicated region fallthrough
CT: control target
= control target key end

     0   :  { %vm458_vm0 = vcmask 130048   ;;  %vm723_vm1 = vcmask 523264   ;;  %vm748_vm2 = vcmask 80896   ;;  %s1433_s1 = inlined_call_operand.vmem [shape: bf16[784,128], index: 1, kind: input, shape index: {}]   ;;  %s1434_s2 = inlined_call_operand.vmem [shape: f32[1,128], index: 2, kind: input, shape index: {}]   ;;  %s1435_s0 = inlined_call_operand.vmem [shape: f32[24,784], index: 0, kind: input, shape index: {}]   ;;  %s1436_s4 = inlined_call_operand.vmem [shape: f32[1,64], index: 4, kind: input, shape index: {}]   ;;  %s1437_s3 = inlined_call_operand.vmem [shape: bf16[128,64], index: 3, kind: input, shape index: {}]   ;;  %s1438_s5 = inlined_call_operand.vmem [shape: bf16[64,10], index: 5, kind: input, shape index: {}]   ;;  %s1439_s6 = inlined_call_operand.vmem [shape: f32[1,10], index: 6, kind: input, shape index: {}]   ;;  %s1440_s7 = inlined_call_operand.vmem [shape: f32[24,10], index: 7, kind: output, shape index: {}]  }
   0x1   :  { %v1047_v0 = vld [vmem:[%s1433_s1 + $0x38] sm:$0xff]  ;;  %v1046_v4 = vld [vmem:[%s1433_s1 + $0x30] sm:$0xff]  ;;  %v1045_v8 = vld [vmem:[%s1433_s1 + $0x28] sm:$0xff] }
   0x2   :  { %v1055_v1 = vld [vmem:[%s1433_s1 + $0x78] sm:$0xff]  ;;  %465 = vmatpush.bf16.msra.mxu0 %v1047_v0  ;;  %v1054_v5 = vld [vmem:[%s1433_s1 + $0x70] sm:$0xff]  ;;  %v1053_v9 = vld [vmem:[%s1433_s1 + $0x68] sm:$0xff] }
   0x3   :  { %v1063_v2 = vld [vmem:[%s1433_s1 + $0xb8] sm:$0xff]  ;;  %483 = vmatpush.bf16.msra.mxu1 %v1055_v1  ;;  %v1062_v6 = vld [vmem:[%s1433_s1 + $0xb0] sm:$0xff]  ;;  %v1061_v10 = vld [vmem:[%s1433_s1 + $0xa8] sm:$0xff] }
   0x4   :  { %v1071_v3 = vld [vmem:[%s1433_s1 + $0xf8] sm:$0xff]  ;;  %501 = vmatpush.bf16.msra.mxu2 %v1063_v2  ;;  %v1070_v7 = vld [vmem:[%s1433_s1 + $0xf0] sm:$0xff]  ;;  %v1069_v11 = vld [vmem:[%s1433_s1 + $0xe8] sm:$0xff] }
   0x5   :  { %519 = vmatpush.bf16.msra.mxu3 %v1071_v3  ;;  %v1044_v12 = vld [vmem:[%s1433_s1 + $0x20] sm:$0xff]  ;;  %v1043_v16 = vld [vmem:[%s1433_s1 + $0x18] sm:$0xff]  ;;  %v1042_v20 = vld [vmem:[%s1433_s1 + $0x10] sm:$0xff] }
   0x6   :  { %466 = vmatpush.bf16.msra.mxu0 %v1046_v4  ;;  %v1052_v13 = vld [vmem:[%s1433_s1 + $0x60] sm:$0xff]  ;;  %v1051_v17 = vld [vmem:[%s1433_s1 + $0x58] sm:$0xff]  ;;  %v1050_v21 = vld [vmem:[%s1433_s1 + $0x50] sm:$0xff] }
   0x7   :  { %484 = vmatpush.bf16.msra.mxu1 %v1054_v5  ;;  %v1060_v14 = vld [vmem:[%s1433_s1 + $0xa0] sm:$0xff]  ;;  %v1059_v18 = vld [vmem:[%s1433_s1 + $0x98] sm:$0xff]  ;;  %v1058_v22 = vld [vmem:[%s1433_s1 + $0x90] sm:$0xff] }
   0x8   :  { %502 = vmatpush.bf16.msra.mxu2 %v1062_v6  ;;  %v1068_v15 = vld [vmem:[%s1433_s1 + $0xe0] sm:$0xff]  ;;  %v1067_v19 = vld [vmem:[%s1433_s1 + $0xd8] sm:$0xff]  ;;  %v1066_v23 = vld [vmem:[%s1433_s1 + $0xd0] sm:$0xff] }
   0x9   :  { %520 = vmatpush.bf16.msra.mxu3 %v1070_v7  ;;  %v1041_v24 = vld [vmem:[%s1433_s1 + $0x8] sm:$0xff]  ;;  %v1040_v28 = vld [vmem:[%s1433_s1] sm:$0xff]  ;;  %v34_v33 = vld [vmem:[%s1435_s0 + $0x38] sm:$0xff] }
   0xa   :  { %467 = vmatpush.bf16.msra.mxu0 %v1045_v8  ;;  %v1049_v25 = vld [vmem:[%s1433_s1 + $0x48] sm:$0xff]  ;;  %v1048_v29 = vld [vmem:[%s1433_s1 + $0x40] sm:$0xff]  ;;  %v29_v36 = vld [vmem:[%s1435_s0 + $0x10] sm:$0xff] }
   0xb   :  { %485 = vmatpush.bf16.msra.mxu1 %v1053_v9  ;;  %v1057_v26 = vld [vmem:[%s1433_s1 + $0x88] sm:$0xff]  ;;  %v1056_v30 = vld [vmem:[%s1433_s1 + $0x80] sm:$0xff]  ;;  %v1079_v39 = vld [vmem:[%s1433_s1 + $0x138] sm:$0xff] }
   0xc   :  { %503 = vmatpush.bf16.msra.mxu2 %v1061_v10  ;;  %v1065_v27 = vld [vmem:[%s1433_s1 + $0xc8] sm:$0xff]  ;;  %v1064_v31 = vld [vmem:[%s1433_s1 + $0xc0] sm:$0xff]  ;;  %v30_v40 = vld [vmem:[%s1435_s0 + $0x18] sm:$0xff] }
   0xd   :  { %521 = vmatpush.bf16.msra.mxu3 %v1069_v11  ;;  %v27_v32 = vld [vmem:[%s1435_s0] sm:$0xff]  ;;  %v28_v34 = vld [vmem:[%s1435_s0 + $0x8] sm:$0xff]  ;;  %v37_v41 = vld [vmem:[%s1435_s0 + $0x50] sm:$0xff] }
   0xe   :  { %468 = vmatpush.bf16.msra.mxu0 %v1044_v12  ;;  %v35_v35 = vld [vmem:[%s1435_s0 + $0x40] sm:$0xff]  ;;  %v36_v37 = vld [vmem:[%s1435_s0 + $0x48] sm:$0xff]  ;;  %v48_v42 = vpack.c.bf16 %v34_v33, %v27_v32  ;;  %v1087_v45 = vld [vmem:[%s1433_s1 + $0x178] sm:$0xff]  ;;  %v51_v46 = vpack.c.bf16 %v37_v41, %v30_v40 }
   0xf   :  { %486 = vmatpush.bf16.msra.mxu1 %v1052_v13  ;;  %v1088_v38 = vld [vmem:[%s1433_s1 + $0x180] sm:$0xff]  ;;  %v49_v43 = vpack.c.bf16 %v35_v35, %v28_v34  ;;  %v50_v44 = vpack.c.bf16 %v36_v37, %v29_v36  ;;  %v1078_v47 = vld [vmem:[%s1433_s1 + $0x130] sm:$0xff]  ;;  %v1077_v49 = vld [vmem:[%s1433_s1 + $0x128] sm:$0xff] }
  0x10   :  { %504 = vmatpush.bf16.msra.mxu2 %v1060_v14  ;;  %v1086_v48 = vld [vmem:[%s1433_s1 + $0x170] sm:$0xff]  ;;  %v1085_v50 = vld [vmem:[%s1433_s1 + $0x168] sm:$0xff]  ;;  %v1076_v51 = vld [vmem:[%s1433_s1 + $0x120] sm:$0xff] }
  0x11   :  { %522 = vmatpush.bf16.msra.mxu3 %v1068_v15  ;;  %v1084_v52 = vld [vmem:[%s1433_s1 + $0x160] sm:$0xff]  ;;  %v41_v53 = vld [vmem:[%s1435_s0 + $0x70] sm:$0xff]  ;;  %v42_v54 = vld [vmem:[%s1435_s0 + $0x78] sm:$0xff] }
  0x12   :  { %469 = vmatpush.bf16.msra.mxu0 %v1043_v16  ;;  %v43_v55 = vld [vmem:[%s1435_s0 + $0x80] sm:$0xff]  ;;  %v1075_v56 = vld [vmem:[%s1433_s1 + $0x118] sm:$0xff]  ;;  %v44_v57 = vld [vmem:[%s1435_s0 + $0x88] sm:$0xff]  ;;  %v55_v58 = vpack.c.bf16 %v41_v53, %v41_v53  ;;  %v56_v59 = vpack.c.bf16 %v42_v54, %v42_v54 }
  0x13   :  { %487 = vmatpush.bf16.msra.mxu1 %v1051_v17  ;;  %v57_v60 = vpack.c.bf16 %v43_v55, %v43_v55  ;;  %v1083_v61 = vld [vmem:[%s1433_s1 + $0x158] sm:$0xff]  ;;  %v58_v62 = vpack.c.bf16 %v44_v57, %v44_v57  ;;  %v1074_v63 = vld [vmem:[%s1433_s1 + $0x110] sm:$0xff]  ;;  %v1073_v1 = vld [vmem:[%s1433_s1 + $0x108] sm:$0xff] }
  0x14   :  { %505 = vmatpush.bf16.msra.mxu2 %v1059_v18  ;;  %v1082_v0 = vld [vmem:[%s1433_s1 + $0x150] sm:$0xff]  ;;  %v1081_v2 = vld [vmem:[%s1433_s1 + $0x148] sm:$0xff]  ;;  %v1072_v3 = vld [vmem:[%s1433_s1 + $0x100] sm:$0xff] }
  0x15   :  { %523 = vmatpush.bf16.msra.mxu3 %v1067_v19  ;;  %v1080_v4 = vld [vmem:[%s1433_s1 + $0x140] sm:$0xff]  ;;  %v38_v6 = vld [vmem:[%s1435_s0 + $0x58] sm:$0xff]  ;;  %v32_v7 = vld [vmem:[%s1435_s0 + $0x28] sm:$0xff] }
  0x16   :  { %470 = vmatpush.bf16.msra.mxu0 %v1042_v20  ;;  %v31_v5 = vld [vmem:[%s1435_s0 + $0x20] sm:$0xff]  ;;  %v33_v9 = vld [vmem:[%s1435_s0 + $0x30] sm:$0xff]  ;;  %v40_v10 = vld [vmem:[%s1435_s0 + $0x68] sm:$0xff] }
  0x17   :  { %488 = vmatpush.bf16.msra.mxu1 %v1050_v21  ;;  %v39_v8 = vld [vmem:[%s1435_s0 + $0x60] sm:$0xff]  ;;  %v52_v11 = vpack.c.bf16 %v38_v6, %v31_v5  ;;  %v54_v13 = vpack.c.bf16 %v40_v10, %v33_v9  ;;  %v45_v14 = vld [vmem:[%s1435_s0 + $0x90] sm:$0xff]  ;;  %v46_v15 = vld [vmem:[%s1435_s0 + $0x98] sm:$0xff] }
  0x18   :  { %506 = vmatpush.bf16.msra.mxu2 %v1058_v22  ;;  %v53_v12 = vpack.c.bf16 %v39_v8, %v32_v7  ;;  %v47_v16 = vld [vmem:[%s1435_s0 + $0xa0] sm:$0xff]  ;;  %v59_v17 = vpack.c.bf16 %v45_v14, %v45_v14  ;;  %v60_v18 = vpack.c.bf16 %v46_v15, %v46_v15  ;;  %v1096_v20 = vld [vmem:[%s1437_s3 + $0x38] sm:$0xff]  ;;  %v1095_v21 = vld [vmem:[%s1437_s3 + $0x30] sm:$0xff] }
  0x19   :  { %524 = vmatpush.bf16.msra.mxu3 %v1066_v23  ;;  %v61_v19 = vpack.c.bf16 %v47_v16, %v47_v16  ;;  %v1094_v22 = vld [vmem:[%s1437_s3 + $0x28] sm:$0xff]  ;;  %v1089_v37 = vld [vmem:[%s1437_s3] sm:$0xff]  ;;  %v1100_v54 = vld [vmem:[%s1438_s5 + $0x18] sm:$0xff] }
  0x1a   :  { %471 = vmatpush.bf16.msra.mxu0 %v1041_v24  ;;  %v1090_v32 = vld [vmem:[%s1437_s3 + $0x8] sm:$0xff] }
  0x1b   :  { %489 = vmatpush.bf16.msra.mxu1 %v1049_v25  ;;  %v1093_v25 = vld [vmem:[%s1437_s3 + $0x20] sm:$0xff] }
  0x1c   :  { %507 = vmatpush.bf16.msra.mxu2 %v1057_v26  ;;  %v1092_v26 = vld [vmem:[%s1437_s3 + $0x18] sm:$0xff] }
  0x1d   :  { %525 = vmatpush.bf16.msra.mxu3 %v1065_v27 }
  0x1e   :  { %472 = vmatpush.bf16.msra.mxu0 %v1040_v28 }
  0x1f   :  { %490 = vmatpush.bf16.msra.mxu1 %v1048_v29 }
  0x20   :  { %508 = vmatpush.bf16.msra.mxu2 %v1056_v30 }
  0x21   :  { %526 = vmatpush.bf16.msra.mxu3 %v1064_v31  ;;  %473 = vmatmul.bf16.vlgmr.msra.gmra.mxu0 %v48_v42  ;;  %v1091_v31 = vld [vmem:[%s1437_s3 + $0x10] sm:$0xff] }
  0x22   :  { %537 = vmatpush.bf16.msrb.mxu0 %v1079_v39  ;;  %491 = vmatmul.bf16.vlgmr.msra.gmra.mxu1 %v49_v43 }
  0x23   :  { %509 = vmatmul.bf16.vlgmr.msra.gmra.mxu2 %v50_v44  ;;  %555 = vmatpush.bf16.msrb.mxu1 %v1087_v45 }
  0x24   :  { %580 = vmatpush.bf16.msrb.mxu2 %v1088_v38  ;;  %527 = vmatmul.bf16.vlgmr.msra.gmra.mxu3 %v51_v46  ;;  %v1105_v38 = vld [vmem:[%s1434_s2] ss:$0 sm:$0xff] }
  0x25   :  { %664 = vmatpush.bf16.msrb.mxu3 %v1096_v20 }
  0x26   :  { %538 = vmatpush.bf16.msrb.mxu0 %v1078_v47 }
  0x27   :  { %556 = vmatpush.bf16.msrb.mxu1 %v1086_v48 }
  0x29   :  { %665 = vmatpush.bf16.msrb.mxu3 %v1095_v21 }
  0x2a   :  { %539 = vmatpush.bf16.msrb.mxu0 %v1077_v49 }
  0x2b   :  { %557 = vmatpush.bf16.msrb.mxu1 %v1085_v50 }
  0x2d   :  { %666 = vmatpush.bf16.msrb.mxu3 %v1094_v22  ;;  %v1097_v22 = vld [vmem:[%s1438_s5] sm:$0xff] }
  0x2e   :  { %540 = vmatpush.bf16.msrb.mxu0 %v1076_v51 }
  0x2f   :  { %558 = vmatpush.bf16.msrb.mxu1 %v1084_v52 }
  0x31   :  { %478 = vmatmul.bf16.gmra.mxu0 %v55_v58  ;;  %667 = vmatpush.bf16.msrb.mxu3 %v1093_v25 }
  0x32   :  { %541 = vmatpush.bf16.msrb.mxu0 %v1075_v56  ;;  %496 = vmatmul.bf16.gmra.mxu1 %v56_v59 }
  0x33   :  { %514 = vmatmul.bf16.gmra.mxu2 %v57_v60  ;;  %559 = vmatpush.bf16.msrb.mxu1 %v1083_v61  ;;  %v1099_v61 = vld [vmem:[%s1438_s5 + $0x10] sm:$0xff] }
  0x34   :  { %532 = vmatmul.bf16.gmra.mxu3 %v58_v62 }
  0x35   :  { %668 = vmatpush.bf16.msrb.mxu3 %v1092_v26 }
  0x36   :  { %542 = vmatpush.bf16.msrb.mxu0 %v1074_v63 }
  0x37   :  { %560 = vmatpush.bf16.msrb.mxu1 %v1082_v0 }
  0x39   :  { %669 = vmatpush.bf16.msrb.mxu3 %v1091_v31 }
  0x3a   :  { %543 = vmatpush.bf16.msrb.mxu0 %v1073_v1  ;;  %v1098_v1 = vld [vmem:[%s1438_s5 + $0x8] sm:$0xff] }
  0x3b   :  { %561 = vmatpush.bf16.msrb.mxu1 %v1081_v2 }
  0x3d   :  { %670 = vmatpush.bf16.msrb.mxu3 %v1090_v32 }
  0x3e   :  { %544 = vmatpush.bf16.msrb.mxu0 %v1072_v3 }
  0x3f   :  { %562 = vmatpush.bf16.msrb.mxu1 %v1080_v4 }
  0x41   :  { %545 = vmatmul.bf16.vlgmr.msrb.gmra.mxu0 %v52_v11  ;;  %671 = vmatpush.bf16.msrb.mxu3 %v1089_v37 }
  0x42   :  { %563 = vmatmul.bf16.vlgmr.msrb.gmra.mxu1 %v53_v12  ;;  %734 = vmatpush.bf16.msra.mxu0 %v1100_v54 }
  0x43   :  { %988 = vmatmul.msk.bf16.vlgmr.msrb.gmra.mxu2 %vm458_vm0, %v54_v13  ;;  %1101 = vmatpush.bf16.msra.mxu1 %v1100_v54 }
  0x46   :  { %735 = vmatpush.bf16.msra.mxu0 %v1099_v61 }
  0x47   :  { %1102 = vmatpush.bf16.msra.mxu1 %v1099_v61 }
  0x4a   :  { %736 = vmatpush.bf16.msra.mxu0 %v1098_v1 }
  0x4b   :  { %1103 = vmatpush.bf16.msra.mxu1 %v1098_v1 }
  0x4e   :  { %737 = vmatpush.bf16.msra.mxu0 %v1097_v22 }
  0x4f   :  { %1104 = vmatpush.bf16.msra.mxu1 %v1097_v22 }
  0x51   :  { %550 = vmatmul.bf16.gmra.mxu0 %v59_v17 }
  0x52   :  { %568 = vmatmul.bf16.gmra.mxu1 %v60_v18 }
  0x53   :  { %989 = vmatmul.msk.bf16.gmra.mxu2 %vm458_vm0, %v61_v19 }
  0x9e   :  { %v474_v23 = vpop.f32.mrf.mxu0 }
  0x9f   :  { %v492_v24 = vpop.f32.mrf.mxu1  ;;  %v475_v43 = vadd.f32 %v1105_v38, %v474_v23 }
  0xa1   :  { %v493_v44 = vadd.f32 %v492_v24, %v475_v43  ;;  %v1106_v24 = vld [vmem:[%s1436_s4] ss:$0 sm:$0xff] }
  0xa6   :  { %v510_v27 = vpop.f32.mrf.mxu2  ;;  %v476_v28 = vpop.f32.mrf.mxu0 }
  0xa7   :  { %v494_v29 = vpop.f32.mrf.mxu1  ;;  %v528_v30 = vpop.f32.mrf.mxu3  ;;  %v477_v45 = vadd.f32 %v1105_v38, %v476_v28  ;;  %v511_v50 = vadd.f32 %v510_v27, %v493_v44 }
  0xa9   :  { %v495_v51 = vadd.f32 %v494_v29, %v477_v45  ;;  %v529_v53 = vadd.f32 %v528_v30, %v511_v50 }
  0xae   :  { %v512_v33 = vpop.f32.mrf.mxu2  ;;  %v479_v34 = vpop.f32.mrf.mxu0 }
  0xaf   :  { %v497_v35 = vpop.f32.mrf.mxu1  ;;  %v530_v36 = vpop.f32.mrf.mxu3  ;;  %v513_v52 = vadd.f32 %v512_v33, %v495_v51  ;;  %v480_v56 = vadd.f32 %v1105_v38, %v479_v34 }
  0xb1   :  { %v531_v57 = vadd.f32 %v530_v36, %v513_v52  ;;  %v498_v63 = vadd.f32 %v497_v35, %v480_v56  ;;  %v1107_v36 = vld [vmem:[%s1439_s6] ss:$0 sm:$0xff] }
  0xb6   :  { %v515_v39 = vpop.f32.mrf.mxu2  ;;  %v481_v40 = vpop.f32.mrf.mxu0 }
  0xb7   :  { %v499_v41 = vpop.f32.mrf.mxu1  ;;  %v533_v42 = vpop.f32.mrf.mxu3  ;;  %v516_v5 = vadd.f32 %v515_v39, %v498_v63 }
  0xb9   :  { %v534_v11 = vadd.f32 %v533_v42, %v516_v5 }
  0xbe   :  { %v517_v46 = vpop.f32.mrf.mxu2  ;;  %v546_v47 = vpop.f32.mrf.mxu0 }
  0xbf   :  { %v564_v48 = vpop.f32.mrf.mxu1  ;;  %v535_v49 = vpop.f32.mrf.mxu3  ;;  %v547_v58 = vadd.f32 %v546_v47, %v529_v53 }
  0xc1   :  { %v565_v0 = vadd.f32 %v564_v48, %v547_v58 }
  0xc6   :  { %v582_v55 = vpop.f32.mrf.mxu2  ;;  %v548_v59 = vpop.f32.mrf.mxu0 }
  0xc7   :  { %v566_v60 = vpop.f32.mrf.mxu1  ;;  %v549_v62 = vadd.f32 %v548_v59, %v531_v57  ;;  %v583_v2 = vadd.f32 %v582_v55, %v565_v0 }
  0xc9   :  { %v567_v3 = vadd.f32 %v566_v60, %v549_v62  ;;  %v591_v9 = vmax.f32 %v583_v2, 0.0 }
  0xce   :  { %v584_v4 = vpop.f32.mrf.mxu2  ;;  %v551_v7 = vpop.f32.mrf.mxu0 }
  0xcf   :  { %v585_v6 = vadd.f32 %v584_v4, %v567_v3  ;;  %v569_v8 = vpop.f32.mrf.mxu1  ;;  %v552_v13 = vadd.f32 %v551_v7, %v534_v11 }
  0xd1   :  { %v592_v10 = vmax.f32 %v585_v6, 0.0  ;;  %v570_v17 = vadd.f32 %v569_v8, %v552_v13 }
  0xd3   :  { %v594_v12 = vpack.c.bf16 %v592_v10, %v591_v9 }
  0xd5   :  { %672 = vmatmul.bf16.vlgmr.msrb.gmra.mxu3 %v594_v12 }
  0xd6   :  { %v587_v14 = vpop.f32.mrf.mxu2  ;;  %v553_v15 = vpop.f32.mrf.mxu0 }
  0xd7   :  { %v571_v16 = vpop.f32.mrf.mxu1  ;;  %v588_v18 = vadd.f32 %v587_v14, %v570_v17 }
  0xd9   :  { %v593_v20 = vmax.f32 %v588_v18, 0.0 }
  0xdb   :  { %v595_v21 = vpack.c.bf16 %v593_v20, %v593_v20 }
  0xde   :  { %v589_v19 = vpop.f32.mrf.mxu2 }
  0xe5   :  { %677 = vmatmul.bf16.gmra.mxu3 %v595_v21 }
 0x158   :  { %v673_v23 = vpop.f32.mrf.mxu3 }
 0x159   :  { %v674_v25 = vadd.f32 %v1106_v24, %v673_v23 }
 0x15b   :  { %v682_v28 = vmax.f32 %v674_v25, 0.0 }
 0x160   :  { %v675_v26 = vpop.f32.mrf.mxu3 }
 0x161   :  { %v676_v27 = vadd.f32 %v1106_v24, %v675_v26 }
 0x163   :  { %v683_v29 = vmax.f32 %v676_v27, 0.0 }
 0x165   :  { %v685_v30 = vpack.c.bf16 %v683_v29, %v682_v28 }
 0x167   :  { %1038 = vmatmul.msk.bf16.vlgmr.msra.gmra.mxu0 %vm723_vm1, %v685_v30 }
 0x168   :  { %v678_v31 = vpop.f32.mrf.mxu3 }
 0x169   :  { %v679_v32 = vadd.f32 %v1106_v24, %v678_v31 }
 0x16b   :  { %v684_v33 = vmax.f32 %v679_v32, 0.0 }
 0x16d   :  { %v686_v34 = vpack.c.bf16 %v684_v33, %v684_v33 }
 0x16f   :  { %1039 = vmatmul.msk.bf16.vlgmr.msra.gmra.mxu1 %vm723_vm1, %v686_v34 }
 0x170   :  { %v680_v35 = vpop.f32.mrf.mxu3 }
 0x1e4   :  { %v739_v37 = vpop.f32.mrf.mxu0 }
 0x1e5   :  { %v740_v38 = vadd.f32 %v1107_v36, %v739_v37 }
 0x1e7   :  { %v749_v39 = vsel %vm748_vm2, %v740_v38, -inf }
 0x1e8   :  { %750 = vmax.xlane.f32.xlu0 %v749_v39 }
 0x1ec   :  { %v741_v40 = vpop.f32.mrf.mxu0  ;;  %v744_v41 = vpop.f32.mrf.mxu1 }
 0x1ed   :  { %v742_v42 = vadd.f32 %v1107_v36, %v741_v40  ;;  %v745_v43 = vadd.f32 %v1107_v36, %v744_v41 }
 0x1ef   :  { %v755_v44 = vsel %vm748_vm2, %v745_v43, -inf  ;;  %v752_v45 = vsel %vm748_vm2, %v742_v42, -inf }
 0x1f0   :  { %756 = vmax.xlane.f32.xlu1 %v755_v44  ;;  %753 = vmax.xlane.f32.xlu0 %v752_v45 }
 0x1f4   :  { %v746_v46 = vpop.f32.mrf.mxu1 }
 0x25b   :  { %v751_v47 = vpop.xlane.xlu0 %750 }
 0x25c   :  { %v758_v48 = vsub.f32 %v740_v38, %v751_v47 }
 0x25e   :  { %v761_v49 = vmul.f32 1.442695, %v758_v48 }
 0x260   :  { %1108 = vpow2.f32 %v761_v49 }
 0x263   :  { %v754_v50 = vpop.xlane.xlu0 %753  ;;  %v757_v51 = vpop.xlane.xlu1 %756 }
 0x264   :  { %v759_v52 = vsub.f32 %v742_v42, %v754_v50  ;;  %v760_v55 = vsub.f32 %v745_v43, %v757_v51 }
 0x266   :  { %v1109_v53 = vpop.eup %1108  ;;  %v763_v54 = vmul.f32 1.442695, %v759_v52  ;;  %v765_v57 = vmul.f32 1.442695, %v760_v55 }
 0x267   :  { %v767_v56 = vsel %vm748_vm2, %v1109_v53, 0.0 }
 0x268   :  { %768 = vadd.xlane.f32.xlu1 %v767_v56  ;;  %1110 = vpow2.f32 %v763_v54 }
 0x269   :  { %1112 = vpow2.f32 %v765_v57 }
 0x26e   :  { %v1111_v58 = vpop.eup %1110 }
 0x26f   :  { %v770_v59 = vsel %vm748_vm2, %v1111_v58, 0.0  ;;  %v1113_v60 = vpop.eup %1112 }
 0x270   :  { %771 = vadd.xlane.f32.xlu2 %v770_v59  ;;  %v773_v61 = vsel %vm748_vm2, %v1113_v60, 0.0 }
 0x278   :  { %774 = vadd.xlane.f32.xlu2 %v773_v61 }
 0x2db   :  { %v769_v62 = vpop.xlane.xlu1 %768 }
 0x2dc   :  { %1114 = vlog2.f32 %v769_v62 }
 0x2e2   :  { %v1115_v63 = vpop.eup %1114 }
 0x2e3   :  { %v777_v0 = vmul.f32 0.6931472, %v1115_v63  ;;  %v772_v1 = vpop.xlane.xlu2 %771 }
 0x2e4   :  { %1116 = vlog2.f32 %v772_v1 }
 0x2e5   :  { %v782_v2 = vsub.f32 %v758_v48, %v777_v0 }
 0x2e7   :  { %785 = vst.msk [vmem:[%s1440_s7] sm:$0xff] %vm748_vm2, %v782_v2 }
 0x2ea   :  { %v1117_v3 = vpop.eup %1116 }
 0x2eb   :  { %v779_v4 = vmul.f32 0.6931472, %v1117_v3  ;;  %v775_v5 = vpop.xlane.xlu2 %774 }
 0x2ec   :  { %1118 = vlog2.f32 %v775_v5 }
 0x2ed   :  { %v783_v6 = vsub.f32 %v759_v52, %v779_v4 }
 0x2ef   :  { %786 = vst.msk [vmem:[%s1440_s7 + $0x8] sm:$0xff] %vm748_vm2, %v783_v6 }
 0x2f2   :  { %v1119_v7 = vpop.eup %1118 }
 0x2f3   :  { %v781_v8 = vmul.f32 0.6931472, %v1119_v7 }
 0x2f5   :  { %v784_v9 = vsub.f32 %v760_v55, %v781_v8 }
 0x2f7   :  { %787 = vst.msk [vmem:[%s1440_s7 + $0x10] sm:$0xff] %vm748_vm2, %v784_v9 }

</bundles_post_ra>
